<compile_context>
chip_gen: v6e
topology: v6e:2x2x1
jax: 0.10.0
libtpu: 0.0.40
codegen_flags: <defaults>
</compile_context>

<pallas_src>
import jax
import jax.numpy as jnp
from jax.experimental import pallas as pl
from jax.experimental.pallas import tpu as pltpu


def _round_up(n, m):
    return ((n + m - 1) // m) * m


def _fc_kernel(x_ref, w1_ref, b1_ref, w2_ref, b2_ref, o_ref):
    # x: (TB, 42), w1: (42, 10), b1: (1, 10), w2: (10, 2), b2: (1, 2)
    h = jnp.dot(x_ref[...], w1_ref[...],
                preferred_element_type=jnp.float32) + b1_ref[...]
    h = jnp.maximum(h, 0.0)                      # relu (VPU, hidden under DMA)
    h = h.astype(w2_ref.dtype)                   # match second matmul operand dtype
    y = jnp.dot(h, w2_ref[...],
                preferred_element_type=jnp.float32) + b2_ref[...]
    o_ref[...] = y.astype(o_ref.dtype)


def prepare_params(w1, b1, w2, b2):
    """One-time layout prep (hoisted out of the per-call path).

    PyTorch stores Linear weights as (out, in); pre-transpose to (in, out)
    so the kernel does plain x @ W, and make biases 2-D row vectors.
    Biases stay f32 so the bias-add happens on the f32 accumulator.
    """
    w1t = jnp.asarray(w1).T                            # (42, 10)
    w2t = jnp.asarray(w2).T                            # (10, 2)
    b1r = jnp.asarray(b1, jnp.float32).reshape(1, -1)  # (1, 10)
    b2r = jnp.asarray(b2, jnp.float32).reshape(1, -1)  # (1, 2)
    return w1t, b1r, w2t, b2r


def fc_forward(x, w1t, b1r, w2t, b2r, *, block_b=8192):
    """x: (B, 42); params from prepare_params(). Returns (B, 2)."""
    B, F = x.shape
    N_out = w2t.shape[1]

    # Batch tile: multiple of 8 (sublane constraint), capped at block_b, and
    # capped at ~ceil(B/2) so the "parallel" grid axis has >=2 steps when
    # possible (both v7x TensorCores get work; no-op on v5e/v6e).
    half = _round_up(max(1, pl.cdiv(B, 2)), 8)
    TB = _round_up(max(8, min(block_b, half)), 8)
    grid = (pl.cdiv(B, TB),)

    # VMEM budget: both the (TB, 42) x block and the (TB, 2) out block are
    # lane-padded to 128 in VMEM and double-buffered by the pipeline.
    itemsize = jnp.dtype(x.dtype).itemsize
    x_buf = TB * 128 * itemsize                 # lane-padded x tile, per copy
    o_buf = TB * 128 * itemsize                 # lane-padded out tile, per copy
    vmem_limit = 2 * (x_buf + o_buf) + (2 << 20)   # double-buffered + headroom
    vmem_limit = int(min(max(vmem_limit, 32 << 20), 48 << 20))

    out = pl.pallas_call(
        _fc_kernel,
        out_shape=jax.ShapeDtypeStruct((B, N_out), x.dtype),
        grid=grid,
        in_specs=[
            pl.BlockSpec((TB, F), lambda i: (i, 0)),          # x tiles along batch
            pl.BlockSpec(w1t.shape, lambda i: (0, 0)),        # weights: same block
            pl.BlockSpec(b1r.shape, lambda i: (0, 0)),        #   every iteration
            pl.BlockSpec(w2t.shape, lambda i: (0, 0)),
            pl.BlockSpec(b2r.shape, lambda i: (0, 0)),
        ],
        out_specs=pl.BlockSpec((TB, N_out), lambda i: (i, 0)),
        compiler_params=pltpu.CompilerParams(
            dimension_semantics=("parallel",),                # megacore on v7x
            vmem_limit_bytes=vmem_limit,
        ),
    )(x, w1t, b1r, w2t, b2r)

    return out


def init_params(key):
    """Deterministic PyTorch-style (uniform +- 1/sqrt(fan_in)) init."""
    k1, k2, k3, k4 = jax.random.split(key, 4)
    bound1 = 1.0 / jnp.sqrt(42.0)
    bound2 = 1.0 / jnp.sqrt(10.0)
    w1 = jax.random.uniform(k1, (10, 42), jnp.float32, -bound1, bound1)
    b1 = jax.random.uniform(k2, (10,), jnp.float32, -bound1, bound1)
    w2 = jax.random.uniform(k3, (2, 10), jnp.float32, -bound2, bound2)
    b2 = jax.random.uniform(k4, (2,), jnp.float32, -bound2, bound2)
    return w1, b1, w2, b2


def _reference(x, w1, b1, w2, b2):
    h = jnp.maximum(x @ w1.T + b1, 0.0)
    return h @ w2.T + b2


if __name__ == "__main__":
    key = jax.random.PRNGKey(0)
    kx, kp, kx2, kx3 = jax.random.split(key, 4)

    w1, b1, w2, b2 = init_params(kp)
    params = prepare_params(w1, b1, w2, b2)   # one-time layout prep

    # Small batch: single grid point (TB == 8).
    B = 8
    x = jax.random.normal(kx, (B, 42), jnp.float32)
    y = jax.block_until_ready(fc_forward(x, *params))
    assert y.shape == (B, 2)
    assert jnp.allclose(y, _reference(x, w1, b1, w2, b2), atol=1e-5, rtol=1e-5)

    # Tiled path with a partial last tile (B=40, TB=16 -> grid=3, last tile
    # half-empty) -- exercises boundary masking, no host-side pad/slice.
    B2 = 40
    x2 = jax.random.normal(kx2, (B2, 42), jnp.float32)
    y2 = jax.block_until_ready(fc_forward(x2, *params, block_b=16))
    assert y2.shape == (B2, 2)
    assert jnp.allclose(y2, _reference(x2, w1, b1, w2, b2), atol=1e-5, rtol=1e-5)

    # Batch not a multiple of 8 at all (B=37): default block_b -> TB=24,
    # grid=2, second tile partial (13 valid rows).
    B3 = 37
    x3 = jax.random.normal(kx3, (B3, 42), jnp.float32)
    y3 = jax.block_until_ready(fc_forward(x3, *params))
    assert y3.shape == (B3, 2)
    assert jnp.allclose(y3, _reference(x3, w1, b1, w2, b2), atol=1e-5, rtol=1e-5)

    print("KERNEL_OK")
</pallas_src>

<mosaic_0001>
module attributes {stable_mosaic.version = 11 : i64} {
  func.func @_fc_kernel(%arg0: i32, %arg1: memref<8x42xf32, #tpu.memory_space<vmem>>, %arg2: memref<42x10xf32, #tpu.memory_space<vmem>>, %arg3: memref<1x10xf32, #tpu.memory_space<vmem>>, %arg4: memref<10x2xf32, #tpu.memory_space<vmem>>, %arg5: memref<1x2xf32, #tpu.memory_space<vmem>>, %arg6: memref<8x2xf32, #tpu.memory_space<vmem>>) attributes {dimension_semantics = [#tpu.dimension_semantics<parallel>], iteration_bounds = array<i64: 1>, scalar_prefetch = 0 : i64, scratch_operands = 0 : i64, tpu.core_type = #tpu.core_type<tc>, window_params = [{transform_indices = @transform_0, window_bounds = array<i64: 8, 42>}, {pipeline_mode = #tpu.pipeline_mode<synchronous>, transform_indices = @transform_1, window_bounds = array<i64: 42, 10>}, {pipeline_mode = #tpu.pipeline_mode<synchronous>, transform_indices = @transform_2, window_bounds = array<i64: 1, 10>}, {pipeline_mode = #tpu.pipeline_mode<synchronous>, transform_indices = @transform_3, window_bounds = array<i64: 10, 2>}, {pipeline_mode = #tpu.pipeline_mode<synchronous>, transform_indices = @transform_4, window_bounds = array<i64: 1, 2>}, {transform_indices = @transform_5, window_bounds = array<i64: 8, 2>}]} {
    %c0 = arith.constant 0 : index
    %c0_0 = arith.constant 0 : index
    %0 = vector.load %arg1[%c0, %c0_0] : memref<8x42xf32, #tpu.memory_space<vmem>>, vector<8x42xf32>
    %c0_1 = arith.constant 0 : index
    %c0_2 = arith.constant 0 : index
    %1 = vector.load %arg2[%c0_1, %c0_2] : memref<42x10xf32, #tpu.memory_space<vmem>>, vector<42x10xf32>
    %cst = arith.constant dense<0.000000e+00> : vector<8x10xf32>
    %2 = tpu.matmul %0, %1, %cst {dimension_numbers = #tpu.dot_dimension_numbers<[1], [0], [0], [1], [0, 0, 1, 1], [], []>} : vector<8x42xf32>, vector<42x10xf32>, vector<8x10xf32> -> vector<8x10xf32>
    %c0_3 = arith.constant 0 : index
    %c0_4 = arith.constant 0 : index
    %3 = vector.load %arg3[%c0_3, %c0_4] : memref<1x10xf32, #tpu.memory_space<vmem>>, vector<1x10xf32>
    %4 = vector.broadcast %3 : vector<1x10xf32> to vector<8x10xf32>
    %5 = arith.addf %2, %4 : vector<8x10xf32>
    %cst_5 = arith.constant 0.000000e+00 : f32
    %6 = vector.broadcast %cst_5 : f32 to vector<8x10xf32>
    %7 = arith.maximumf %5, %6 : vector<8x10xf32>
    %c0_6 = arith.constant 0 : index
    %c0_7 = arith.constant 0 : index
    %8 = vector.load %arg4[%c0_6, %c0_7] : memref<10x2xf32, #tpu.memory_space<vmem>>, vector<10x2xf32>
    %cst_8 = arith.constant dense<0.000000e+00> : vector<8x2xf32>
    %9 = tpu.matmul %7, %8, %cst_8 {dimension_numbers = #tpu.dot_dimension_numbers<[1], [0], [0], [1], [0, 0, 1, 1], [], []>} : vector<8x10xf32>, vector<10x2xf32>, vector<8x2xf32> -> vector<8x2xf32>
    %c0_9 = arith.constant 0 : index
    %c0_10 = arith.constant 0 : index
    %10 = vector.load %arg5[%c0_9, %c0_10] : memref<1x2xf32, #tpu.memory_space<vmem>>, vector<1x2xf32>
    %11 = vector.broadcast %10 : vector<1x2xf32> to vector<8x2xf32>
    %12 = arith.addf %9, %11 : vector<8x2xf32>
    %c0_11 = arith.constant 0 : index
    %c0_12 = arith.constant 0 : index
    %13 = vector.load %arg6[%c0_11, %c0_12] : memref<8x2xf32, #tpu.memory_space<vmem>>, vector<8x2xf32>
    tpu.vector_store %arg6[%c0_11, %c0_12], %12 {strides = array<i32>} : memref<8x2xf32, #tpu.memory_space<vmem>>, vector<8x2xf32>,
    return
  }
  func.func @transform_0(%arg0: i32) -> (i32, i32) {
    %c0_i32 = arith.constant 0 : i32
    %c0_i32_0 = arith.constant 0 : i32
    return %arg0, %c0_i32 : i32, i32
  }
  func.func @transform_1(%arg0: i32) -> (i32, i32) {
    %c0_i32 = arith.constant 0 : i32
    %c0_i32_0 = arith.constant 0 : i32
    %c0_i32_1 = arith.constant 0 : i32
    return %c0_i32, %c0_i32_0 : i32, i32
  }
  func.func @transform_2(%arg0: i32) -> (i32, i32) {
    %c0_i32 = arith.constant 0 : i32
    %c0_i32_0 = arith.constant 0 : i32
    %c0_i32_1 = arith.constant 0 : i32
    return %c0_i32, %c0_i32_0 : i32, i32
  }
  func.func @transform_3(%arg0: i32) -> (i32, i32) {
    %c0_i32 = arith.constant 0 : i32
    %c0_i32_0 = arith.constant 0 : i32
    %c0_i32_1 = arith.constant 0 : i32
    return %c0_i32, %c0_i32_0 : i32, i32
  }
  func.func @transform_4(%arg0: i32) -> (i32, i32) {
    %c0_i32 = arith.constant 0 : i32
    %c0_i32_0 = arith.constant 0 : i32
    %c0_i32_1 = arith.constant 0 : i32
    return %c0_i32, %c0_i32_0 : i32, i32
  }
  func.func @transform_5(%arg0: i32) -> (i32, i32) {
    %c0_i32 = arith.constant 0 : i32
    %c0_i32_0 = arith.constant 0 : i32
    return %arg0, %c0_i32 : i32, i32
  }
}

</mosaic_0001>

<bundles_post_ra>
// kernel: tpu_custom_call.1
= control target key start
LH: loop header
LB: loop body
LE: loop exit
PB: predicated region body
PF: predicated region fallthrough
CT: control target
= control target key end

     0   :  { %vm38_vm0 = vcmask 1041408   ;;  %v245_v0 = vmov 0.0   ;;  %vm246_vm1 = vmmov 0   ;;  %vm34_vm2 = vcmask 343040   ;;  %s315_s1 = inlined_call_operand.vmem [shape: f32[42,10], index: 1, kind: input, shape index: {}]   ;;  %s316_s0 = inlined_call_operand.vmem [shape: f32[8,42], index: 0, kind: input, shape index: {}]   ;;  %s317_s3 = inlined_call_operand.vmem [shape: f32[10,2], index: 3, kind: input, shape index: {}]   ;;  %s318_s2 = inlined_call_operand.vmem [shape: f32[1,10], index: 2, kind: input, shape index: {}]   ;;  %s319_s4 = inlined_call_operand.vmem [shape: f32[1,2], index: 4, kind: input, shape index: {}]   ;;  %s320_s5 = inlined_call_operand.vmem [shape: f32[8,2], index: 5, kind: output, shape index: {}]  }
   0x1   :  { %221 = vmatprep.subr.mxu0 %v245_v0  ;;  %v26_v1 = vld [vmem:[%s315_s1 + $0x28] sm:$0x3]  ;;  %v25_v2 = vld [vmem:[%s315_s1 + $0x20] sm:$0xff]  ;;  %233 = vmatprep.mubr.msk.f32.mxu0 %vm246_vm1, %v245_v0  ;;  %v24_v3 = vld [vmem:[%s315_s1 + $0x18] sm:$0xff]  ;;  %vm122_vm3 = vcmask 80896   ;;  %vm199_vm4 = vcmask 15360  }
   0x2   :  { %222 = vmatpush3.msk.msra.mxu0 %vm38_vm0, %v26_v1  ;;  %236 = vmatprep.subr.mxu1 %v245_v0  ;;  %v23_v4 = vld [vmem:[%s315_s1 + $0x10] sm:$0xff]  ;;  %v22_v5 = vld [vmem:[%s315_s1 + $0x8] sm:$0xff]  ;;  %v21_v6 = vld [vmem:[%s315_s1] sm:$0xff] }
   0x3   :  { %223 = vmatprep.subr.mxu0 %v245_v0  ;;  %240 = vmatprep.mubr.msk.f32.mxu1 %vm246_vm1, %v245_v0  ;;  %v20_v7 = vld [vmem:[%s316_s0] sm:$0xff]  ;;  %v114_v8 = vld [vmem:[%s317_s3 + $0x8] sm:$0x3] }
   0x4   :  { %224 = vmatpush3.msra.mxu0 %v25_v2  ;;  %237 = vmatpush3.msk.msra.mxu1 %vm38_vm0, %v114_v8  ;;  %v113_v9 = vld [vmem:[%s317_s3] sm:$0xff] }
   0x5   :  { %225 = vmatprep.subr.mxu0 %v245_v0  ;;  %238 = vmatprep.subr.mxu1 %v245_v0  ;;  %v205_v10 = vld [vmem:[%s318_s2] ss:$0 sm:$0xff] }
   0x6   :  { %226 = vmatpush3.msra.mxu0 %v24_v3  ;;  %239 = vmatpush3.msra.mxu1 %v113_v9  ;;  %v208_v15 = vld [vmem:[%s319_s4] ss:$0 sm:$0xff] }
   0x7   :  { %227 = vmatprep.subr.mxu0 %v245_v0 }
   0x8   :  { %228 = vmatpush3.msra.mxu0 %v23_v4 }
   0x9   :  { %229 = vmatprep.subr.mxu0 %v245_v0 }
   0xa   :  { %230 = vmatpush3.msra.mxu0 %v22_v5 }
   0xb   :  { %231 = vmatprep.subr.mxu0 %v245_v0 }
   0xc   :  { %232 = vmatpush3.msra.mxu0 %v21_v6 }
   0xd   :  { %234 = vmatmul.mubr.msk.f32.vlgmr.msra.gmra.mxu0 %vm34_vm2, %v20_v7 }
  0xcd   :  { %v108_v11 = vpop.f32.mrf.mxu0 }
  0xce   :  { %v109_v12 = vadd.f32 %v205_v10, %v108_v11 }
  0xcf   :  { %v235_v13 = vpop.f32.mrf.mxu0 }
  0xd0   :  { %v112_v14 = vmax.f32 %v109_v12, 0.0 }
  0xd2   :  { %241 = vmatmul.mubr.msk.f32.vlgmr.msra.gmra.mxu1 %vm122_vm3, %v112_v14 }
 0x192   :  { %v195_v16 = vpop.f32.mrf.mxu1 }
 0x193   :  { %v196_v17 = vadd.f32 %v208_v15, %v195_v16 }
 0x194   :  { %v242_v18 = vpop.f32.mrf.mxu1 }
 0x195   :  { %200 = vst.msk [vmem:[%s320_s5] sm:$0xff] %vm199_vm4, %v196_v17 }

</bundles_post_ra>
